<compile_context>
chip_gen: v6e
topology: v6e:2x2x1
jax: 0.10.0
libtpu: 0.0.40
codegen_flags: <defaults>
</compile_context>

<pallas_src>
import functools

import jax
import jax.numpy as jnp
import numpy as np
from jax.experimental import pallas as pl
from jax.experimental.pallas import tpu as pltpu

_EPS_DIR = 1e-6      # divide-by-zero guard on directions (matches torch code)
_EPS_FAR = 1e-6      # fars >= nears + 1e-6 (matches torch code)
_LANES = 128
_MAX_TILE_ROWS = 1024   # 8 MiB double-buffered pipeline I/O -> safe on v5e/v6e/v7x
_STRIP_ROWS = 128       # compute strip: 7ish live (128,128) f32 values ~= 0.45 MiB


def _aabb_collider_kernel(od_ref, nears_ref, fars_ref, *, aabb, near_plane,
                          strip_rows, num_strips, tail_rows):
    """Ray / axis-aligned-box intersection for one tile of rays.

    od_ref   : (6, TR, 128) f32 VMEM; rows 0..2 = origin xyz, 3..5 = dir xyz
               (component-major, sublane/lane-dense slabs).
    nears_ref, fars_ref : (TR, 128) f32 outputs (sublane/lane dense).
    aabb     : ((xmin,ymin,zmin),(xmax,ymax,zmax)) compile-time constants.
    """

    def strip_body(r0, strip):
        nears = jnp.full((strip, _LANES), -jnp.inf, dtype=jnp.float32)
        fars = jnp.full((strip, _LANES), jnp.inf, dtype=jnp.float32)
        # Unrolled reduction over the 3 axes (t1..t6 in the torch reference),
        # one (strip, 128) component slab at a time.
        for ax in range(3):
            o_ax = od_ref[ax, pl.ds(r0, strip), :]
            d_ax = od_ref[3 + ax, pl.ds(r0, strip), :]
            inv = pl.reciprocal(d_ax + _EPS_DIR, approx=False)  # dir_fraction
            t_lo = (aabb[0][ax] - o_ax) * inv
            t_hi = (aabb[1][ax] - o_ax) * inv
            nears = jnp.maximum(nears, jnp.minimum(t_lo, t_hi))
            fars = jnp.minimum(fars, jnp.maximum(t_lo, t_hi))
        nears = jnp.maximum(nears, near_plane)      # torch.clamp(min=near_plane)
        fars = jnp.maximum(fars, nears + _EPS_FAR)  # torch.maximum(fars, nears+1e-6)
        nears_ref[pl.ds(r0, strip), :] = nears
        fars_ref[pl.ds(r0, strip), :] = fars

    # Full strips (short fixed trip count -> unroll for scheduler visibility).
    align = strip_rows & -strip_rows  # largest power-of-two divisor
    def body(s, carry):
        strip_body(pl.multiple_of(s * strip_rows, align), strip_rows)
        return carry
    jax.lax.fori_loop(0, num_strips, body, 0, unroll=True)

    # Static tail (tile_rows need not be a multiple of the strip size).
    if tail_rows > 0:
        strip_body(num_strips * strip_rows, tail_rows)


def _choose_tiling(n, max_tile_rows):
    """Pick (tile_rows, rows_pad): big tiles, >=2 grid steps when possible."""
    rows = pl.cdiv(n, _LANES)
    rows8 = pl.cdiv(rows, 8) * 8
    g = pl.cdiv(rows8, max_tile_rows)
    if g == 1 and rows8 >= 16:
        g = 2   # >= 2 parallel grid steps so v7x's two TensorCores both get work
    tile_rows = pl.cdiv(rows8, g * 8) * 8       # balanced tiles, multiple of 8
    rows_pad = pl.cdiv(rows8, tile_rows) * tile_rows
    return tile_rows, rows_pad


def scene_collider_forward(origins, directions, aabb, *, near_plane=0.0,
                           nears=None, fars=None, tile_n=131072):
    """SceneCollider.forward: returns (nears, fars), each shaped (N, 1)."""
    # Base-class gate: if nears and fars are already set, pass through.
    if nears is not None and fars is not None:
        return nears, fars

    n = origins.shape[0]
    max_tile_rows = max(8, min(tile_n // _LANES, _MAX_TILE_ROWS))
    tile_rows, rows_pad = _choose_tiling(n, max_tile_rows)
    n_pad = rows_pad * _LANES

    strip_rows = min(_STRIP_ROWS, tile_rows)
    num_strips = tile_rows // strip_rows
    tail_rows = tile_rows - num_strips * strip_rows

    # One repack for both inputs: (N,3)+(N,3) -> single (6, rows_pad, 128)
    # component-major slab (one concat + one pad + one transpose; the reshape
    # is row-major/free).  Zero padding is benign: 1/(0 + 1e-6) is finite and
    # padded-ray results are sliced off below.
    od = jnp.concatenate([origins.astype(jnp.float32),
                          directions.astype(jnp.float32)], axis=1)    # (N, 6)
    od = jnp.pad(od, ((0, n_pad - n), (0, 0)))                        # (n_pad, 6)
    od = od.T.reshape(6, rows_pad, _LANES)                            # (6, R, 128)

    # Bake the box + near plane as compile-time constants (removes the SMEM
    # operand and per-step scalar loads).  Note: requires a concrete aabb; a
    # traced aabb would need an SMEM operand instead.
    aabb_np = np.asarray(aabb, dtype=np.float32).reshape(2, 3)
    aabb_const = tuple(tuple(float(v) for v in row) for row in aabb_np)

    kernel = functools.partial(
        _aabb_collider_kernel, aabb=aabb_const, near_plane=float(near_plane),
        strip_rows=strip_rows, num_strips=num_strips, tail_rows=tail_rows)

    nears_p, fars_p = pl.pallas_call(
        kernel,
        out_shape=(
            jax.ShapeDtypeStruct((rows_pad, _LANES), jnp.float32),
            jax.ShapeDtypeStruct((rows_pad, _LANES), jnp.float32),
        ),
        grid_spec=pltpu.PrefetchScalarGridSpec(
            num_scalar_prefetch=0,
            grid=(rows_pad // tile_rows,),
            in_specs=[
                pl.BlockSpec((6, tile_rows, _LANES), lambda i: (0, i, 0)),
            ],
            out_specs=[
                pl.BlockSpec((tile_rows, _LANES), lambda i: (i, 0)),
                pl.BlockSpec((tile_rows, _LANES), lambda i: (i, 0)),
            ],
        ),
        compiler_params=pltpu.CompilerParams(
            dimension_semantics=("parallel",),
            allow_input_fusion=[True]),
    )(od)

    nears_out = nears_p.reshape(-1)[:n][:, None]   # (N, 1)
    fars_out = fars_p.reshape(-1)[:n][:, None]     # (N, 1)
    return nears_out, fars_out


def _reference(origins, directions, aabb, near_plane):
    """Pure-JAX reference of the torch AABBBoxCollider math (for checking)."""
    inv = 1.0 / (directions + _EPS_DIR)
    t_lo = (aabb[0][None, :] - origins) * inv      # (N, 3)
    t_hi = (aabb[1][None, :] - origins) * inv      # (N, 3)
    nears = jnp.max(jnp.minimum(t_lo, t_hi), axis=1)
    fars = jnp.min(jnp.maximum(t_lo, t_hi), axis=1)
    nears = jnp.maximum(nears, near_plane)
    fars = jnp.maximum(fars, nears + _EPS_FAR)
    return nears[:, None], fars[:, None]


def _make_rays(k_o, k_d, n):
    o = jax.random.uniform(k_o, (n, 3), jnp.float32, minval=-0.5, maxval=0.5)
    d = jax.random.normal(k_d, (n, 3), jnp.float32)
    d = d / jnp.linalg.norm(d, axis=-1, keepdims=True)
    return o, d


if __name__ == "__main__":
    key = jax.random.PRNGKey(0)
    keys = jax.random.split(key, 6)

    # Deterministic "parameters": scene box AABB and near plane (nerfstudio defaults).
    aabb = jnp.array([[-1.0, -1.0, -1.0], [1.0, 1.0, 1.0]], jnp.float32)
    near_plane = 0.05

    # ---- Small single-tile case -------------------------------------------
    N = 256
    origins, directions = _make_rays(keys[0], keys[1], N)
    nears, fars = scene_collider_forward(origins, directions, aabb,
                                         near_plane=near_plane)
    nears, fars = jax.block_until_ready((nears, fars))

    # Gate check: already-set nears/fars pass through untouched.
    g_nears, g_fars = scene_collider_forward(origins, directions, aabb,
                                             near_plane=near_plane,
                                             nears=nears, fars=fars)
    assert g_nears is nears and g_fars is fars

    ref_nears, ref_fars = _reference(origins, directions, aabb, near_plane)
    np.testing.assert_allclose(np.asarray(nears), np.asarray(ref_nears),
                               rtol=1e-5, atol=1e-5)
    np.testing.assert_allclose(np.asarray(fars), np.asarray(ref_fars),
                               rtol=1e-5, atol=1e-5)
    assert nears.shape == (N, 1) and fars.shape == (N, 1)

    # ---- Multi-tile case with ragged tail (forced tiny tile: grid = 3) -----
    N2 = 2500
    origins2, directions2 = _make_rays(keys[2], keys[3], N2)
    nears2, fars2 = scene_collider_forward(origins2, directions2, aabb,
                                           near_plane=near_plane, tile_n=1024)
    nears2, fars2 = jax.block_until_ready((nears2, fars2))
    ref_nears2, ref_fars2 = _reference(origins2, directions2, aabb, near_plane)
    np.testing.assert_allclose(np.asarray(nears2), np.asarray(ref_nears2),
                               rtol=1e-5, atol=1e-5)
    np.testing.assert_allclose(np.asarray(fars2), np.asarray(ref_fars2),
                               rtol=1e-5, atol=1e-5)
    assert nears2.shape == (N2, 1) and fars2.shape == (N2, 1)

    # ---- Default tiling path: >=2 grid steps, multi-strip inner loop + tail --
    N3 = 200_000
    origins3, directions3 = _make_rays(keys[4], keys[5], N3)
    nears3, fars3 = scene_collider_forward(origins3, directions3, aabb,
                                           near_plane=near_plane)
    nears3, fars3 = jax.block_until_ready((nears3, fars3))
    ref_nears3, ref_fars3 = _reference(origins3, directions3, aabb, near_plane)
    np.testing.assert_allclose(np.asarray(nears3), np.asarray(ref_nears3),
                               rtol=1e-5, atol=1e-5)
    np.testing.assert_allclose(np.asarray(fars3), np.asarray(ref_fars3),
                               rtol=1e-5, atol=1e-5)
    assert nears3.shape == (N3, 1) and fars3.shape == (N3, 1)

    print("KERNEL_OK")
</pallas_src>

<mosaic_0001>
module attributes {stable_mosaic.version = 11 : i64} {
  func.func @_aabb_collider_kernel(%arg0: i32, %arg1: memref<6x8x128xf32, #tpu.memory_space<vmem>>, %arg2: memref<8x128xf32, #tpu.memory_space<vmem>>, %arg3: memref<8x128xf32, #tpu.memory_space<vmem>>) attributes {dimension_semantics = [#tpu.dimension_semantics<parallel>], iteration_bounds = array<i64: 1>, scalar_prefetch = 0 : i64, scratch_operands = 0 : i64, tpu.core_type = #tpu.core_type<tc>, window_params = [{transform_indices = @transform_0, window_bounds = array<i64: 6, 8, 128>}, {transform_indices = @transform_1, window_bounds = array<i64: 8, 128>}, {transform_indices = @transform_2, window_bounds = array<i64: 8, 128>}]} {
    %c0_i32 = arith.constant 0 : i32
    %c8_i32 = arith.constant 8 : i32
    %0 = arith.muli %c0_i32, %c8_i32 : i32
    %1 = tpu.assume_multiple %0, 8 : i32
    %cst = arith.constant 0xFF800000 : f32
    %2 = vector.broadcast %cst : f32 to vector<8x128xf32>
    %cst_0 = arith.constant 0x7F800000 : f32
    %3 = vector.broadcast %cst_0 : f32 to vector<8x128xf32>
    %c0 = arith.constant 0 : index
    %4 = arith.index_cast %1 : i32 to index
    %c0_1 = arith.constant 0 : index
    %5 = vector.load %arg1[%c0, %4, %c0_1] : memref<6x8x128xf32, #tpu.memory_space<vmem>>, vector<1x8x128xf32>
    %6 = vector.shape_cast %5 : vector<1x8x128xf32> to vector<8x128xf32>
    %c3 = arith.constant 3 : index
    %7 = arith.index_cast %1 : i32 to index
    %c0_2 = arith.constant 0 : index
    %8 = vector.load %arg1[%c3, %7, %c0_2] : memref<6x8x128xf32, #tpu.memory_space<vmem>>, vector<1x8x128xf32>
    %9 = vector.shape_cast %8 : vector<1x8x128xf32> to vector<8x128xf32>
    %cst_3 = arith.constant 9.99999997E-7 : f32
    %10 = vector.broadcast %cst_3 : f32 to vector<8x128xf32>
    %11 = arith.addf %9, %10 : vector<8x128xf32>
    %12 = tpu.reciprocal %11 : vector<8x128xf32> -> vector<8x128xf32>
    %cst_4 = arith.constant -1.000000e+00 : f32
    %13 = vector.broadcast %cst_4 : f32 to vector<8x128xf32>
    %14 = arith.subf %13, %6 : vector<8x128xf32>
    %15 = arith.mulf %14, %12 : vector<8x128xf32>
    %cst_5 = arith.constant 1.000000e+00 : f32
    %16 = vector.broadcast %cst_5 : f32 to vector<8x128xf32>
    %17 = arith.subf %16, %6 : vector<8x128xf32>
    %18 = arith.mulf %17, %12 : vector<8x128xf32>
    %19 = arith.minimumf %15, %18 : vector<8x128xf32>
    %20 = arith.maximumf %2, %19 : vector<8x128xf32>
    %21 = arith.maximumf %15, %18 : vector<8x128xf32>
    %22 = arith.minimumf %3, %21 : vector<8x128xf32>
    %c1 = arith.constant 1 : index
    %23 = arith.index_cast %1 : i32 to index
    %c0_6 = arith.constant 0 : index
    %24 = vector.load %arg1[%c1, %23, %c0_6] : memref<6x8x128xf32, #tpu.memory_space<vmem>>, vector<1x8x128xf32>
    %25 = vector.shape_cast %24 : vector<1x8x128xf32> to vector<8x128xf32>
    %c4 = arith.constant 4 : index
    %26 = arith.index_cast %1 : i32 to index
    %c0_7 = arith.constant 0 : index
    %27 = vector.load %arg1[%c4, %26, %c0_7] : memref<6x8x128xf32, #tpu.memory_space<vmem>>, vector<1x8x128xf32>
    %28 = vector.shape_cast %27 : vector<1x8x128xf32> to vector<8x128xf32>
    %cst_8 = arith.constant 9.99999997E-7 : f32
    %29 = vector.broadcast %cst_8 : f32 to vector<8x128xf32>
    %30 = arith.addf %28, %29 : vector<8x128xf32>
    %31 = tpu.reciprocal %30 : vector<8x128xf32> -> vector<8x128xf32>
    %cst_9 = arith.constant -1.000000e+00 : f32
    %32 = vector.broadcast %cst_9 : f32 to vector<8x128xf32>
    %33 = arith.subf %32, %25 : vector<8x128xf32>
    %34 = arith.mulf %33, %31 : vector<8x128xf32>
    %cst_10 = arith.constant 1.000000e+00 : f32
    %35 = vector.broadcast %cst_10 : f32 to vector<8x128xf32>
    %36 = arith.subf %35, %25 : vector<8x128xf32>
    %37 = arith.mulf %36, %31 : vector<8x128xf32>
    %38 = arith.minimumf %34, %37 : vector<8x128xf32>
    %39 = arith.maximumf %20, %38 : vector<8x128xf32>
    %40 = arith.maximumf %34, %37 : vector<8x128xf32>
    %41 = arith.minimumf %22, %40 : vector<8x128xf32>
    %c2 = arith.constant 2 : index
    %42 = arith.index_cast %1 : i32 to index
    %c0_11 = arith.constant 0 : index
    %43 = vector.load %arg1[%c2, %42, %c0_11] : memref<6x8x128xf32, #tpu.memory_space<vmem>>, vector<1x8x128xf32>
    %44 = vector.shape_cast %43 : vector<1x8x128xf32> to vector<8x128xf32>
    %c5 = arith.constant 5 : index
    %45 = arith.index_cast %1 : i32 to index
    %c0_12 = arith.constant 0 : index
    %46 = vector.load %arg1[%c5, %45, %c0_12] : memref<6x8x128xf32, #tpu.memory_space<vmem>>, vector<1x8x128xf32>
    %47 = vector.shape_cast %46 : vector<1x8x128xf32> to vector<8x128xf32>
    %cst_13 = arith.constant 9.99999997E-7 : f32
    %48 = vector.broadcast %cst_13 : f32 to vector<8x128xf32>
    %49 = arith.addf %47, %48 : vector<8x128xf32>
    %50 = tpu.reciprocal %49 : vector<8x128xf32> -> vector<8x128xf32>
    %cst_14 = arith.constant -1.000000e+00 : f32
    %51 = vector.broadcast %cst_14 : f32 to vector<8x128xf32>
    %52 = arith.subf %51, %44 : vector<8x128xf32>
    %53 = arith.mulf %52, %50 : vector<8x128xf32>
    %cst_15 = arith.constant 1.000000e+00 : f32
    %54 = vector.broadcast %cst_15 : f32 to vector<8x128xf32>
    %55 = arith.subf %54, %44 : vector<8x128xf32>
    %56 = arith.mulf %55, %50 : vector<8x128xf32>
    %57 = arith.minimumf %53, %56 : vector<8x128xf32>
    %58 = arith.maximumf %39, %57 : vector<8x128xf32>
    %59 = arith.maximumf %53, %56 : vector<8x128xf32>
    %60 = arith.minimumf %41, %59 : vector<8x128xf32>
    %cst_16 = arith.constant 5.000000e-02 : f32
    %61 = vector.broadcast %cst_16 : f32 to vector<8x128xf32>
    %62 = arith.maximumf %58, %61 : vector<8x128xf32>
    %cst_17 = arith.constant 9.99999997E-7 : f32
    %63 = vector.broadcast %cst_17 : f32 to vector<8x128xf32>
    %64 = arith.addf %62, %63 : vector<8x128xf32>
    %65 = arith.maximumf %60, %64 : vector<8x128xf32>
    %66 = arith.index_cast %1 : i32 to index
    %c0_18 = arith.constant 0 : index
    %67 = vector.load %arg2[%66, %c0_18] : memref<8x128xf32, #tpu.memory_space<vmem>>, vector<8x128xf32>
    tpu.vector_store %arg2[%66, %c0_18], %62 {strides = array<i32>} : memref<8x128xf32, #tpu.memory_space<vmem>>, vector<8x128xf32>,
    %68 = arith.index_cast %1 : i32 to index
    %c0_19 = arith.constant 0 : index
    %69 = vector.load %arg3[%68, %c0_19] : memref<8x128xf32, #tpu.memory_space<vmem>>, vector<8x128xf32>
    tpu.vector_store %arg3[%68, %c0_19], %65 {strides = array<i32>} : memref<8x128xf32, #tpu.memory_space<vmem>>, vector<8x128xf32>,
    %c1_i32 = arith.constant 1 : i32
    return
  }
  func.func @transform_0(%arg0: i32) -> (i32, i32, i32) {
    %c0_i32 = arith.constant 0 : i32
    %c0_i32_0 = arith.constant 0 : i32
    %c0_i32_1 = arith.constant 0 : i32
    return %c0_i32, %arg0, %c0_i32_0 : i32, i32, i32
  }
  func.func @transform_1(%arg0: i32) -> (i32, i32) {
    %c0_i32 = arith.constant 0 : i32
    %c0_i32_0 = arith.constant 0 : i32
    return %arg0, %c0_i32 : i32, i32
  }
  func.func @transform_2(%arg0: i32) -> (i32, i32) {
    %c0_i32 = arith.constant 0 : i32
    %c0_i32_0 = arith.constant 0 : i32
    return %arg0, %c0_i32 : i32, i32
  }
}

</mosaic_0001>

<bundles_post_ra>
// kernel: tpu_custom_call.1
= control target key start
LH: loop header
LB: loop body
LE: loop exit
PB: predicated region body
PF: predicated region fallthrough
CT: control target
= control target key end

     0   :  { %8 = vsyncpa [#allocation3], 0  ;;  %s215_s0 = inlined_call_operand.hbm [shape: f32[6,8,128], index: 0, kind: input, shape index: {}]   ;;  %s216_s1 = inlined_call_operand.hbm [shape: f32[8,128], index: 1, kind: output, shape index: {0}]   ;;  %s217_s2 = inlined_call_operand.hbm [shape: f32[8,128], index: 2, kind: output, shape index: {1}]  }
   0x1   :  { %9 = vsyncpa [#allocation4], 0 }
   0x2   :  { %10 = vsyncpa [#allocation7], 0  ;;  %s186_s9 = smov [#allocation2]  }
   0x3   :  { %s16_s10 = sshll.u32 %s186_s9, 4  ;;  %s17_s10 = int_to_ptr.vmem [resolvable:$true] %s16_s10 }
   0x4   :  { %s128_s11 = scalar_lea.vmem %s17_s10, 768  ;;  %p133_p1 = scmp.lt.s32.totalorder %s17_s10, %s17_s10 }
   0x5   :  { %p129_p0 = scmp.ne.s32.totalorder %s17_s10, %s128_s11  ;;  %p134_p2 = scmp.lt.s32.totalorder %s128_s11, %s128_s11 }
   0x7   :  { %p135_p3 = por %p134_p2, %p133_p1 }
   0x9   :  { %p136_p4 = pnand %p135_p3, %p129_p0 }
   0xb   :  { %139 = shalt.err (!%p136_p4)
}
   0xc   :  { %s187_s12 = smov 128   ;;  %s188_s13 = smov 8  }
   0xd   :  { %22 = dma.hbm_to_vmem [thread:$0]  %s215_s0, 768, %s17_s10, [#allocation3], %s187_s12, %s187_s12, %s188_s13  }
   0xe   :  { %180 = dma.done.wait [#allocation3], 768  }
   0xf   :  { %181 = vsyncadd [#allocation3], 4294966528  ;;  %v29_v0 = vld [vmem:[#allocation2 + $0x18] sm:$0xff]  ;;  %v43_v2 = vld [vmem:[#allocation2 + $0x20] sm:$0xff]  ;;  %s189_s0 = smov [#allocation5]   ;;  %s190_s17 = smov [#allocation6]  }
  0x10   :  { %v30_v1 = vadd.f32 1e-06, %v29_v0  ;;  %v44_v3 = vadd.f32 1e-06, %v43_v2  ;;  %v59_v4 = vld [vmem:[#allocation2 + $0x28] sm:$0xff]  ;;  %v26_v6 = vld [vmem:[#allocation2] sm:$0xff] }
  0x11   :  { %v60_v5 = vadd.f32 1e-06, %v59_v4  ;;  %v40_v7 = vld [vmem:[#allocation2 + $0x8] sm:$0xff]  ;;  %v56_v8 = vld [vmem:[#allocation2 + $0x10] sm:$0xff]  ;;  %v32_v9 = vsub.f32 -1.0, %v26_v6  ;;  %v34_v10 = vsub.f32 1.0, %v26_v6 }
  0x12   :  { %114 = vrcp.f32 %v30_v1  ;;  %v46_v11 = vsub.f32 -1.0, %v40_v7  ;;  %v48_v12 = vsub.f32 1.0, %v40_v7  ;;  %v62_v13 = vsub.f32 -1.0, %v56_v8  ;;  %s81_s16 = sshll.u32 %s189_s0, 4  ;;  %s91_s18 = sshll.u32 %s190_s17, 4  ;;  %s82_s16 = int_to_ptr.vmem [resolvable:$true] %s81_s16  ;;  %s92_s18 = int_to_ptr.vmem [resolvable:$true] %s91_s18 }
  0x13   :  { %116 = vrcp.f32 %v44_v3  ;;  %v64_v14 = vsub.f32 1.0, %v56_v8  ;;  %s140_s19 = scalar_lea.vmem %s82_s16, 128  ;;  %p145_p6 = scmp.lt.s32.totalorder %s82_s16, %s82_s16 }
  0x14   :  { %118 = vrcp.f32 %v60_v5  ;;  %p141_p5 = scmp.ne.s32.totalorder %s82_s16, %s140_s19  ;;  %p146_p7 = scmp.lt.s32.totalorder %s140_s19, %s140_s19 }
  0x16   :  { %p147_p8 = por %p146_p7, %p145_p6 }
  0x18   :  { %p148_p9 = pnand %p147_p8, %p141_p5 }
  0x1f   :  { %v115_v15 = vpop.eup %114 }
  0x20   :  { %v117_v16 = vpop.eup %116  ;;  %v33_v17 = vmul.f32 %v115_v15, %v32_v9  ;;  %v35_v18 = vmul.f32 %v115_v15, %v34_v10 }
  0x21   :  { %v119_v19 = vpop.eup %118  ;;  %v47_v20 = vmul.f32 %v117_v16, %v46_v11  ;;  %v49_v21 = vmul.f32 %v117_v16, %v48_v12 }
  0x22   :  { %v36_v22 = vmin.f32 %v33_v17, %v35_v18  ;;  %v63_v23 = vmul.f32 %v119_v19, %v62_v13  ;;  %v65_v24 = vmul.f32 %v119_v19, %v64_v14  ;;  %v37_v25 = vmax.f32 %v33_v17, %v35_v18 }
  0x23   :  { %v50_v26 = vmin.f32 %v47_v20, %v49_v21  ;;  %v52_v27 = vmax.f32 %v47_v20, %v49_v21 }
  0x24   :  { %v66_v28 = vmin.f32 %v63_v23, %v65_v24  ;;  %v68_v31 = vmax.f32 %v63_v23, %v65_v24 }
  0x25   :  { %v51_v29 = vmax.f32 %v36_v22, %v50_v26  ;;  %v53_v30 = vmin.f32 %v37_v25, %v52_v27 }
  0x27   :  { %v67_v32 = vmax.f32 %v51_v29, %v66_v28  ;;  %v69_v34 = vmin.f32 %v53_v30, %v68_v31 }
  0x29   :  { %v70_v33 = vmax.f32 %v67_v32, 0.05 }
  0x2b   :  { %73 = vst [vmem:[#allocation5] sm:$0xff] %v70_v33  ;;  %v71_v35 = vadd.f32 1e-06, %v70_v33 }
  0x2c   :  { %151 = shalt.err (!%p148_p9)
}
  0x2d   :  { %84 = dma.vmem_to_hbm [thread:$0]  %s82_s16, 128, %s216_s1, [#allocation4]   ;;  %v72_v36 = vmax.f32 %v69_v34, %v71_v35 }
  0x2e   :  { %s160_s22 = scalar_lea.vmem %s92_s18, 128  ;;  %p165_p11 = scmp.lt.s32.totalorder %s92_s18, %s92_s18 }
  0x2f   :  { %74 = vst [vmem:[#allocation6] sm:$0xff] %v72_v36  ;;  %p161_p10 = scmp.ne.s32.totalorder %s92_s18, %s160_s22  ;;  %p166_p12 = scmp.lt.s32.totalorder %s160_s22, %s160_s22 }
  0x31   :  { %p167_p13 = por %p166_p12, %p165_p11 }
  0x33   :  { %p168_p0 = pnand %p167_p13, %p161_p10 }
  0x35   :  { %171 = shalt.err (!%p168_p0)
}
  0x36   :  { %94 = dma.vmem_to_hbm [thread:$0]  %s92_s18, 128, %s217_s2, [#allocation7]  }
  0x37   :  { %182 = dma.done.wait [#allocation4], 128  }
  0x38   :  { %183 = vsyncadd [#allocation4], 4294967168 }
  0x39   :  { %184 = dma.done.wait [#allocation7], 128  }
  0x3a   :  { %185 = vsyncadd [#allocation7], 4294967168 }
  0x3b   :  { %101 = vsyncpa [#allocation3], 1 }
  0x3c   :  { %102 = vsyncpa [#allocation4], 1 }
  0x3d   :  { %103 = vsyncpa [#allocation7], 1 }

</bundles_post_ra>
